<compile_context>
chip_gen: v6e
topology: v6e:2x2x1
jax: 0.10.0
libtpu: 0.0.40
codegen_flags: <defaults>
</compile_context>

<pallas_src>
import jax
import jax.numpy as jnp
from jax.experimental import pallas as pl
from jax.experimental.pallas import tpu as pltpu


def _round_up(x, m):
    return ((x + m - 1) // m) * m


def _pick_block_b(batch):
    """Batch tile: multiple of 16 (bf16 sublane packing), prefer a divisor of B
    (pad/slice become no-ops), >=2 tiles for v7x's two TensorCores when the
    batch allows it, capped at 2048 rows to bound VMEM."""
    cap = 2048
    if batch % 32 == 0 and batch // 2 <= cap:
        return batch // 2                      # two even tiles, no padding
    if batch % 16 == 0 and batch <= cap:
        return batch                           # one tile, no padding
    if batch % 16 == 0:
        for cand in range(cap, 15, -16):       # largest mult-of-16 divisor <= cap
            if batch % cand == 0:
                return cand
    return min(cap, _round_up(batch, 16))


def sac_critic_kernel(state_ref, action_ref,
                      w1_ref, b1_ref, w2_ref, b2_ref, w3_ref, b3_ref,
                      q_ref):
    """One batch tile: (BN pre-folded) 3-layer MLP -> fused argmax-gather -> q."""
    # Layer 1 (BN already folded into w1/b1): bf16 state straight into the MXU.
    h1 = jnp.dot(state_ref[...], w1_ref[...],
                 preferred_element_type=jnp.float32) + b1_ref[...]      # (TB, H) f32
    h1 = jnp.where(h1 > 0, h1, 0.01 * h1)

    h2 = jnp.dot(h1.astype(jnp.bfloat16), w2_ref[...],
                 preferred_element_type=jnp.float32) + b2_ref[...]      # (TB, H) f32
    h2 = jnp.where(h2 > 0, h2, 0.01 * h2)

    all_q = jnp.dot(h2.astype(jnp.bfloat16), w3_ref[...],
                    preferred_element_type=jnp.float32) + b3_ref[...]   # (TB, A) f32

    # Fused argmax-gather (first max on ties, matching torch.max(dim=1)).
    a = action_ref[...]                                                 # (TB, A) f32
    num_a = a.shape[1]
    col = jax.lax.broadcasted_iota(jnp.int32, a.shape, 1)               # (TB, A)
    row_max = jnp.max(a, axis=1, keepdims=True)                         # (TB, 1)
    idx = jnp.min(jnp.where(a == row_max, col, num_a),
                  axis=1, keepdims=True)                                # (TB, 1) first argmax
    q_ref[...] = jnp.sum(jnp.where(col == idx, all_q, 0.0),
                         axis=1, keepdims=True)                         # (TB, 1)


def sac_critic_forward(state, action, params, *, block_b=None):
    """Fused SACCritic forward for a single agent; returns q of shape (B, 1).

    nagents > 1 would stack per-agent weights along a leading axis and add an
    agent grid dimension; the default module config (nagents=1) is implemented.
    """
    w1, b1, w2, b2, w3, b3 = params
    B, S = state.shape
    A = action.shape[1]
    H = w1.shape[1]

    # --- BatchNorm1d (train mode) stats in ONE pass over state, then folded
    # --- into the first linear layer (W1', b1').  b1' stays f32.
    mean = jnp.mean(state, axis=0)                                       # (S,)
    var = jnp.maximum(jnp.mean(state * state, axis=0) - mean * mean, 0.0)
    inv_std = jax.lax.rsqrt(var + 1e-5)                                  # (S,)
    w1f = (w1 * inv_std[:, None]).astype(jnp.bfloat16)                   # (S, H)
    b1f = b1 - jnp.dot(mean * inv_std, w1)                               # (1, H) f32

    w2b = w2.astype(jnp.bfloat16)
    w3b = w3.astype(jnp.bfloat16)

    # --- Batch tiling (pad only if B doesn't already fit the tile grid).
    if block_b is None:
        block_b = _pick_block_b(B)
    b_pad = _round_up(B, block_b)

    state_b = state.astype(jnp.bfloat16)                                 # halve streamed bytes
    if b_pad != B:
        state_b = jnp.pad(state_b, ((0, b_pad - B), (0, 0)))
        action_p = jnp.pad(action, ((0, b_pad - B), (0, 0)))
    else:
        action_p = action

    grid = (b_pad // block_b,)
    q = pl.pallas_call(
        sac_critic_kernel,
        out_shape=jax.ShapeDtypeStruct((b_pad, 1), jnp.float32),
        grid_spec=pltpu.PrefetchScalarGridSpec(
            num_scalar_prefetch=0,
            grid=grid,
            in_specs=[
                pl.BlockSpec((block_b, S), lambda i: (i, 0)),   # state tile (bf16, streamed)
                pl.BlockSpec((block_b, A), lambda i: (i, 0)),   # action tile (f32, streamed)
                pl.BlockSpec((S, H), lambda i: (0, 0)),         # W1' (bf16, resident)
                pl.BlockSpec((1, H), lambda i: (0, 0)),         # b1' (f32, resident)
                pl.BlockSpec((H, H), lambda i: (0, 0)),         # W2  (bf16, resident)
                pl.BlockSpec((1, H), lambda i: (0, 0)),         # b2  (f32, resident)
                pl.BlockSpec((H, A), lambda i: (0, 0)),         # W3  (bf16, resident)
                pl.BlockSpec((1, A), lambda i: (0, 0)),         # b3  (f32, resident)
            ],
            out_specs=pl.BlockSpec((block_b, 1), lambda i: (i, 0)),
        ),
        compiler_params=pltpu.CompilerParams(
            dimension_semantics=("parallel",),   # shards batch tiles across the 2 TCs on v7x
            vmem_limit_bytes=32 * 1024 * 1024,   # safe on v5e/v6e/v7x (64 MiB physical on v7x)
        ),
    )(state_b, action_p, w1f, b1f, w2b, b2, w3b, b3)

    return q[:B]   # padded tail rows (garbage q from zero-padded actions) sliced off


def init_params(key, num_in_pol, num_out_pol, hidden_dim):
    """Deterministic PyTorch-style uniform init; weights stored as (in, out)."""
    ks = jax.random.split(key, 6)

    def linear(kw, kb, fan_in, fan_out):
        bound = 1.0 / jnp.sqrt(jnp.float32(fan_in))
        w = jax.random.uniform(kw, (fan_in, fan_out), jnp.float32, -bound, bound)
        b = jax.random.uniform(kb, (1, fan_out), jnp.float32, -bound, bound)
        return w, b

    w1, b1 = linear(ks[0], ks[1], num_in_pol, hidden_dim)    # s_enc_fc1
    w2, b2 = linear(ks[2], ks[3], hidden_dim, hidden_dim)    # critic_fc1
    w3, b3 = linear(ks[4], ks[5], hidden_dim, num_out_pol)   # critic_fc2
    return (w1, b1, w2, b2, w3, b3)


def reference_forward_f32(state, action, params):
    """Pure-f32 JAX reference mirroring the PyTorch forward exactly."""
    w1, b1, w2, b2, w3, b3 = params
    mean = jnp.mean(state, axis=0, keepdims=True)
    var = jnp.mean(jnp.square(state - mean), axis=0, keepdims=True)   # biased (BN train)
    xn = (state - mean) * jax.lax.rsqrt(var + 1e-5)
    h1 = jnp.dot(xn, w1) + b1
    h1 = jnp.where(h1 > 0, h1, 0.01 * h1)
    h2 = jnp.dot(h1, w2) + b2
    h2 = jnp.where(h2 > 0, h2, 0.01 * h2)
    all_q = jnp.dot(h2, w3) + b3
    int_acs = jnp.argmax(action, axis=1)
    return jnp.take_along_axis(all_q, int_acs[:, None], axis=1)


def reference_forward_kernel_math(state, action, params):
    """Reference that emulates the kernel's exact numerics: single-pass stats,
    BN folded into W1/b1, bf16 MXU operands, f32 accumulate/elementwise."""
    w1, b1, w2, b2, w3, b3 = params
    mean = jnp.mean(state, axis=0)
    var = jnp.maximum(jnp.mean(state * state, axis=0) - mean * mean, 0.0)
    inv_std = jax.lax.rsqrt(var + 1e-5)
    w1f = (w1 * inv_std[:, None]).astype(jnp.bfloat16)
    b1f = b1 - jnp.dot(mean * inv_std, w1)

    h1 = jnp.dot(state.astype(jnp.bfloat16), w1f,
                 preferred_element_type=jnp.float32) + b1f
    h1 = jnp.where(h1 > 0, h1, 0.01 * h1)
    h2 = jnp.dot(h1.astype(jnp.bfloat16), w2.astype(jnp.bfloat16),
                 preferred_element_type=jnp.float32) + b2
    h2 = jnp.where(h2 > 0, h2, 0.01 * h2)
    all_q = jnp.dot(h2.astype(jnp.bfloat16), w3.astype(jnp.bfloat16),
                    preferred_element_type=jnp.float32) + b3
    int_acs = jnp.argmax(action, axis=1)
    return jnp.take_along_axis(all_q, int_acs[:, None], axis=1)


if __name__ == "__main__":
    # Module-default shapes: num_in_pol=16, num_out_pol=8, hidden_dim=32,
    # nagents=1.  batch=24 with block_b=16 exercises a 2-step batch grid,
    # batch padding (24 -> 32) and the fused in-kernel argmax-gather.
    B, NUM_STATES, NUM_ACTIONS, HIDDEN = 24, 16, 8, 32

    key = jax.random.PRNGKey(0)
    k_state, k_action, k_params = jax.random.split(key, 3)

    state = jax.random.normal(k_state, (B, NUM_STATES), jnp.float32)
    action = jax.random.normal(k_action, (B, NUM_ACTIONS), jnp.float32)
    params = init_params(k_params, NUM_STATES, NUM_ACTIONS, HIDDEN)

    q = jax.block_until_ready(sac_critic_forward(state, action, params, block_b=16))

    q_ref_kernel = reference_forward_kernel_math(state, action, params)
    q_ref_f32 = reference_forward_f32(state, action, params)

    assert q.shape == (B, 1)
    assert jnp.allclose(q, q_ref_kernel, atol=1e-3, rtol=1e-3), (q, q_ref_kernel)
    assert jnp.allclose(q, q_ref_f32, atol=5e-2, rtol=5e-2), (q, q_ref_f32)

    # Second run using the automatic tile picker (no padding path, 2 even tiles).
    B2 = 64
    state2 = jax.random.normal(jax.random.PRNGKey(1), (B2, NUM_STATES), jnp.float32)
    action2 = jax.random.normal(jax.random.PRNGKey(2), (B2, NUM_ACTIONS), jnp.float32)
    q2 = jax.block_until_ready(sac_critic_forward(state2, action2, params))
    q2_ref = reference_forward_f32(state2, action2, params)
    assert q2.shape == (B2, 1)
    assert jnp.allclose(q2, q2_ref, atol=5e-2, rtol=5e-2), (q2, q2_ref)

    print("KERNEL_OK")
</pallas_src>

<mosaic_0001>
module attributes {stable_mosaic.version = 11 : i64} {
  func.func @sac_critic_kernel(%arg0: i32, %arg1: memref<16x16xbf16, #tpu.memory_space<vmem>>, %arg2: memref<16x8xf32, #tpu.memory_space<vmem>>, %arg3: memref<16x32xbf16, #tpu.memory_space<vmem>>, %arg4: memref<1x32xf32, #tpu.memory_space<vmem>>, %arg5: memref<32x32xbf16, #tpu.memory_space<vmem>>, %arg6: memref<1x32xf32, #tpu.memory_space<vmem>>, %arg7: memref<32x8xbf16, #tpu.memory_space<vmem>>, %arg8: memref<1x8xf32, #tpu.memory_space<vmem>>, %arg9: memref<16x1xf32, #tpu.memory_space<vmem>>) attributes {dimension_semantics = [#tpu.dimension_semantics<parallel>], iteration_bounds = array<i64: 2>, scalar_prefetch = 0 : i64, scratch_operands = 0 : i64, tpu.core_type = #tpu.core_type<tc>, window_params = [{transform_indices = @transform_0, window_bounds = array<i64: 16, 16>}, {transform_indices = @transform_1, window_bounds = array<i64: 16, 8>}, {pipeline_mode = #tpu.pipeline_mode<synchronous>, transform_indices = @transform_2, window_bounds = array<i64: 16, 32>}, {pipeline_mode = #tpu.pipeline_mode<synchronous>, transform_indices = @transform_3, window_bounds = array<i64: 1, 32>}, {pipeline_mode = #tpu.pipeline_mode<synchronous>, transform_indices = @transform_4, window_bounds = array<i64: 32, 32>}, {pipeline_mode = #tpu.pipeline_mode<synchronous>, transform_indices = @transform_5, window_bounds = array<i64: 1, 32>}, {pipeline_mode = #tpu.pipeline_mode<synchronous>, transform_indices = @transform_6, window_bounds = array<i64: 32, 8>}, {pipeline_mode = #tpu.pipeline_mode<synchronous>, transform_indices = @transform_7, window_bounds = array<i64: 1, 8>}, {transform_indices = @transform_8, window_bounds = array<i64: 16, 1>}]} {
    %c0 = arith.constant 0 : index
    %c0_0 = arith.constant 0 : index
    %0 = vector.load %arg1[%c0, %c0_0] : memref<16x16xbf16, #tpu.memory_space<vmem>>, vector<16x16xbf16>
    %c0_1 = arith.constant 0 : index
    %c0_2 = arith.constant 0 : index
    %1 = vector.load %arg3[%c0_1, %c0_2] : memref<16x32xbf16, #tpu.memory_space<vmem>>, vector<16x32xbf16>
    %cst = arith.constant dense<0.000000e+00> : vector<16x32xf32>
    %2 = tpu.matmul %0, %1, %cst {dimension_numbers = #tpu.dot_dimension_numbers<[1], [0], [0], [1], [0, 0, 1, 1], [], []>} : vector<16x16xbf16>, vector<16x32xbf16>, vector<16x32xf32> -> vector<16x32xf32>
    %c0_3 = arith.constant 0 : index
    %c0_4 = arith.constant 0 : index
    %3 = vector.load %arg4[%c0_3, %c0_4] : memref<1x32xf32, #tpu.memory_space<vmem>>, vector<1x32xf32>
    %4 = vector.broadcast %3 : vector<1x32xf32> to vector<16x32xf32>
    %5 = arith.addf %2, %4 : vector<16x32xf32>
    %cst_5 = arith.constant 0.000000e+00 : f32
    %6 = vector.broadcast %cst_5 : f32 to vector<16x32xf32>
    %7 = arith.cmpf ogt, %5, %6 : vector<16x32xf32>
    %cst_6 = arith.constant 0.00999999977 : f32
    %8 = vector.broadcast %cst_6 : f32 to vector<16x32xf32>
    %9 = arith.mulf %8, %5 : vector<16x32xf32>
    %10 = arith.select %7, %5, %9 : vector<16x32xi1>, vector<16x32xf32>
    %11 = arith.truncf %10 : vector<16x32xf32> to vector<16x32xbf16>
    %c0_7 = arith.constant 0 : index
    %c0_8 = arith.constant 0 : index
    %12 = vector.load %arg5[%c0_7, %c0_8] : memref<32x32xbf16, #tpu.memory_space<vmem>>, vector<32x32xbf16>
    %cst_9 = arith.constant dense<0.000000e+00> : vector<16x32xf32>
    %13 = tpu.matmul %11, %12, %cst_9 {dimension_numbers = #tpu.dot_dimension_numbers<[1], [0], [0], [1], [0, 0, 1, 1], [], []>} : vector<16x32xbf16>, vector<32x32xbf16>, vector<16x32xf32> -> vector<16x32xf32>
    %c0_10 = arith.constant 0 : index
    %c0_11 = arith.constant 0 : index
    %14 = vector.load %arg6[%c0_10, %c0_11] : memref<1x32xf32, #tpu.memory_space<vmem>>, vector<1x32xf32>
    %15 = vector.broadcast %14 : vector<1x32xf32> to vector<16x32xf32>
    %16 = arith.addf %13, %15 : vector<16x32xf32>
    %cst_12 = arith.constant 0.000000e+00 : f32
    %17 = vector.broadcast %cst_12 : f32 to vector<16x32xf32>
    %18 = arith.cmpf ogt, %16, %17 : vector<16x32xf32>
    %cst_13 = arith.constant 0.00999999977 : f32
    %19 = vector.broadcast %cst_13 : f32 to vector<16x32xf32>
    %20 = arith.mulf %19, %16 : vector<16x32xf32>
    %21 = arith.select %18, %16, %20 : vector<16x32xi1>, vector<16x32xf32>
    %22 = arith.truncf %21 : vector<16x32xf32> to vector<16x32xbf16>
    %c0_14 = arith.constant 0 : index
    %c0_15 = arith.constant 0 : index
    %23 = vector.load %arg7[%c0_14, %c0_15] : memref<32x8xbf16, #tpu.memory_space<vmem>>, vector<32x8xbf16>
    %cst_16 = arith.constant dense<0.000000e+00> : vector<16x8xf32>
    %24 = tpu.matmul %22, %23, %cst_16 {dimension_numbers = #tpu.dot_dimension_numbers<[1], [0], [0], [1], [0, 0, 1, 1], [], []>} : vector<16x32xbf16>, vector<32x8xbf16>, vector<16x8xf32> -> vector<16x8xf32>
    %c0_17 = arith.constant 0 : index
    %c0_18 = arith.constant 0 : index
    %25 = vector.load %arg8[%c0_17, %c0_18] : memref<1x8xf32, #tpu.memory_space<vmem>>, vector<1x8xf32>
    %26 = vector.broadcast %25 : vector<1x8xf32> to vector<16x8xf32>
    %27 = arith.addf %24, %26 : vector<16x8xf32>
    %c0_19 = arith.constant 0 : index
    %c0_20 = arith.constant 0 : index
    %28 = vector.load %arg2[%c0_19, %c0_20] : memref<16x8xf32, #tpu.memory_space<vmem>>, vector<16x8xf32>
    %29 = tpu.iota {dimensions = array<i32: 1>} : vector<16x8xi32>
    %cst_21 = arith.constant dense<0xFF800000> : vector<16xf32>
    %30 = vector.multi_reduction <maximumf>, %28, %cst_21 [1] : vector<16x8xf32> to vector<16xf32>
    %31 = vector.shape_cast %30 : vector<16xf32> to vector<16x1xf32>
    %32 = vector.broadcast %31 : vector<16x1xf32> to vector<16x8xf32>
    %33 = arith.cmpf oeq, %28, %32 : vector<16x8xf32>
    %c8_i32 = arith.constant 8 : i32
    %34 = vector.broadcast %c8_i32 : i32 to vector<16x8xi32>
    %35 = arith.select %33, %29, %34 : vector<16x8xi1>, vector<16x8xi32>
    %cst_22 = arith.constant dense<2147483647> : vector<16xi32>
    %36 = vector.multi_reduction <minsi>, %35, %cst_22 [1] : vector<16x8xi32> to vector<16xi32>
    %37 = vector.shape_cast %36 : vector<16xi32> to vector<16x1xi32>
    %38 = vector.broadcast %37 : vector<16x1xi32> to vector<16x8xi32>
    %39 = arith.cmpi eq, %29, %38 : vector<16x8xi32>
    %cst_23 = arith.constant 0.000000e+00 : f32
    %40 = vector.broadcast %cst_23 : f32 to vector<16x8xf32>
    %41 = arith.select %39, %27, %40 : vector<16x8xi1>, vector<16x8xf32>
    %cst_24 = arith.constant dense<0.000000e+00> : vector<16xf32>
    %42 = vector.multi_reduction <add>, %41, %cst_24 [1] : vector<16x8xf32> to vector<16xf32>
    %43 = vector.shape_cast %42 : vector<16xf32> to vector<16x1xf32>
    %c0_25 = arith.constant 0 : index
    %c0_26 = arith.constant 0 : index
    %44 = vector.load %arg9[%c0_25, %c0_26] : memref<16x1xf32, #tpu.memory_space<vmem>>, vector<16x1xf32>
    tpu.vector_store %arg9[%c0_25, %c0_26], %43 {strides = array<i32>} : memref<16x1xf32, #tpu.memory_space<vmem>>, vector<16x1xf32>,
    return
  }
  func.func @transform_0(%arg0: i32) -> (i32, i32) {
    %c0_i32 = arith.constant 0 : i32
    %c0_i32_0 = arith.constant 0 : i32
    return %arg0, %c0_i32 : i32, i32
  }
  func.func @transform_1(%arg0: i32) -> (i32, i32) {
    %c0_i32 = arith.constant 0 : i32
    %c0_i32_0 = arith.constant 0 : i32
    return %arg0, %c0_i32 : i32, i32
  }
  func.func @transform_2(%arg0: i32) -> (i32, i32) {
    %c0_i32 = arith.constant 0 : i32
    %c0_i32_0 = arith.constant 0 : i32
    %c0_i32_1 = arith.constant 0 : i32
    return %c0_i32, %c0_i32_0 : i32, i32
  }
  func.func @transform_3(%arg0: i32) -> (i32, i32) {
    %c0_i32 = arith.constant 0 : i32
    %c0_i32_0 = arith.constant 0 : i32
    %c0_i32_1 = arith.constant 0 : i32
    return %c0_i32, %c0_i32_0 : i32, i32
  }
  func.func @transform_4(%arg0: i32) -> (i32, i32) {
    %c0_i32 = arith.constant 0 : i32
    %c0_i32_0 = arith.constant 0 : i32
    %c0_i32_1 = arith.constant 0 : i32
    return %c0_i32, %c0_i32_0 : i32, i32
  }
  func.func @transform_5(%arg0: i32) -> (i32, i32) {
    %c0_i32 = arith.constant 0 : i32
    %c0_i32_0 = arith.constant 0 : i32
    %c0_i32_1 = arith.constant 0 : i32
    return %c0_i32, %c0_i32_0 : i32, i32
  }
  func.func @transform_6(%arg0: i32) -> (i32, i32) {
    %c0_i32 = arith.constant 0 : i32
    %c0_i32_0 = arith.constant 0 : i32
    %c0_i32_1 = arith.constant 0 : i32
    return %c0_i32, %c0_i32_0 : i32, i32
  }
  func.func @transform_7(%arg0: i32) -> (i32, i32) {
    %c0_i32 = arith.constant 0 : i32
    %c0_i32_0 = arith.constant 0 : i32
    %c0_i32_1 = arith.constant 0 : i32
    return %c0_i32, %c0_i32_0 : i32, i32
  }
  func.func @transform_8(%arg0: i32) -> (i32, i32) {
    %c0_i32 = arith.constant 0 : i32
    %c0_i32_0 = arith.constant 0 : i32
    return %arg0, %c0_i32 : i32, i32
  }
}

</mosaic_0001>

<bundles_post_ra>
// kernel: tpu_custom_call.1
= control target key start
LH: loop header
LB: loop body
LE: loop exit
PB: predicated region body
PF: predicated region fallthrough
CT: control target
= control target key end

     0   :  { %s800_s27 = smov 0   ;;  %s877_s0 = inlined_call_operand.vmem [shape: bf16[32,16], index: 0, kind: input, shape index: {}]   ;;  %s878_s1 = inlined_call_operand.vmem [shape: f32[32,8], index: 1, kind: input, shape index: {}]   ;;  %s879_s2 = inlined_call_operand.vmem [shape: bf16[16,32], index: 2, kind: input, shape index: {}]   ;;  %s880_s3 = inlined_call_operand.vmem [shape: f32[1,32], index: 3, kind: input, shape index: {}]   ;;  %s881_s4 = inlined_call_operand.vmem [shape: bf16[32,32], index: 4, kind: input, shape index: {}]   ;;  %s882_s5 = inlined_call_operand.vmem [shape: f32[1,32], index: 5, kind: input, shape index: {}]   ;;  %s883_s6 = inlined_call_operand.vmem [shape: bf16[32,8], index: 6, kind: input, shape index: {}]   ;;  %s884_s7 = inlined_call_operand.vmem [shape: f32[1,8], index: 7, kind: input, shape index: {}]   ;;  %s885_s8 = inlined_call_operand.vmem [shape: f32[32,1], index: 8, kind: output, shape index: {}]  }
   0x1 LB: > { %s674_s28 = sadd.s32 4294967295, %s751_s27   ;;  %p678_p0 = scmp.ge.s32.totalorder %s751_s27, 1  ;;  %s751_s27 = sphi %s800_s27, %s18_s27  }
   0x2   : > { %p274_p1 = scmp.lt.s32.totalorder %s751_s27, 3 }
   0x4   : > { %p275_p2 = pnand %p678_p0, %p274_p1 }
   0x5   : > { %s679_s9 = sshll.u32 (!%p275_p2), %s674_s28, 1 }
   0x6   : > { %278 = sbr.rel (%p275_p2) target bundleno = 764 (0x2fc), region = 52  ;;  %p314_p3 = scmp.lt.s32.totalorder (!%p275_p2), %s679_s9, 3 }
   0xb   : > { %v739_v0 = vld [vmem:[%s879_s2] sm:$0xff]   ;;  %v753_v1 = vmov 0.0   ;;  %vm754_vm0 = vmmov 0   ;;  %s887_s9 = smov (!%p314_p3, %s679_s9), 3  ;;  %vm354_vm1 = vcmask 130048   ;;  %vm552_vm2 = vcmask 64512  }
   0xc   : > { %707 = vmatprep.subr.bf16.mxu0 %v753_v1  ;;  %713 = vmatprep.subr.bf16.mxu1 %v753_v1  ;;  %s680_s10 = sshll.u32 %s887_s9, 2  ;;  %s682_s11 = sshll.u32 %s887_s9, 3  ;;  %v741_v7 = vld [vmem:[%s881_s4 + $0x8] sm:$0xff]   ;;  %v742_v8 = vld [vmem:[%s881_s4] sm:$0xff]   ;;  %v550_v9 = vlaneseq  ;;  %vm429_vm7 = vcmask 261120   ;;  %vm603_vm14 = vcmask 7168  }
   0xd   : > { %708 = vmatpush3.bf16.msra.mxu0 %v739_v0  ;;  %709 = vmatprep.mubr.msk.bf16.mxu0 %vm754_vm0, %v753_v1  ;;  %s317_s14 = scalar_lea.vmem %s877_s0, %s680_s10  ;;  %s323_s17 = scalar_lea.vmem %s878_s1, %s682_s11  ;;  %v685_v21 = vld [vmem:[%s880_s3] ss:$0 sm:$0xff]  ;;  %v743_v33 = vld [vmem:[%s883_s6 + $0x8] sm:$0xff]  }
   0xe   : > { %717 = vmatprep.mubr.msk.bf16.mxu1 %vm754_vm0, %v753_v1  ;;  %721 = vmatprep.subr.bf16.mxu0 %v753_v1  ;;  %v740_v2 = vld [vmem:[%s317_s14] sm:$0xff]   ;;  %v549_v4 = vld [vmem:[%s323_s17 + $0x8] sm:$0xff]  ;;  %v841_v10 = vand.u32 127, %v550_v9  ;;  %s329_s15 = scalar_lea.vmem %s885_s8, %s682_s11 }
   0xf   : > { %v548_v3 = vld [vmem:[%s323_s17] sm:$0xff]  ;;  %v556_v6 = vsel %vm552_vm2, %v549_v4, -inf  ;;  %714 = vmatpush3.bf16.msra.mxu1 %v741_v7 }
  0x10   : > { %710 = vmatmul.mubr.msk.bf16.vlgmr.msra.gmra.mxu0 %vm354_vm1, %v740_v2  ;;  %v553_v5 = vsel %vm552_vm2, %v548_v3, -inf  ;;  %715 = vmatprep.subr.bf16.mxu1 %v753_v1  ;;  %v744_v34 = vld [vmem:[%s883_s6] sm:$0xff]  }
  0x11   : > { %554 = vmax.xlane.f32.xlu0 %v553_v5  ;;  %725 = vmatprep.mubr.msk.bf16.mxu0 %vm754_vm0, %v753_v1  ;;  %v689_v43 = vld [vmem:[%s882_s5] ss:$0 sm:$0xff] }
  0x12   : > { %722 = vmatpush3.bf16.msra.mxu0 %v743_v33  ;;  %v693_v0 = vld [vmem:[%s884_s7] ss:$0 sm:$0xff] }
  0x13   : > { %716 = vmatpush3.bf16.msra.mxu1 %v742_v8  ;;  %723 = vmatprep.subr.bf16.mxu0 %v753_v1 }
  0x15   : > { %557 = vmax.xlane.f32.xlu0 %v556_v6 }
  0x16   : > { %724 = vmatpush3.bf16.msra.mxu0 %v744_v34 }
  0x9a   : > { %v555_v11 = vpop.xlane.xlu0 %554 }
  0x9b   : > { %vm559_vm3 = vcmp.eq.f32.partialorder %v548_v3, %v555_v11 }
  0x9c   : > { %v561_v12 = vsel %vm559_vm3, %v841_v10, 8 }
  0x9d   : > { %v563_v13 = vsel %vm552_vm2, %v561_v12, 2147483647 }
  0x9e   : > { %v558_v14 = vpop.xlane.xlu0 %557  ;;  %v565_v15 = vshra.s32 %v563_v13, 16  ;;  %v564_v35 = vand.u32 65535, %v563_v13 }
  0x9f   : > { %vm560_vm4 = vcmp.eq.f32.partialorder %v549_v4, %v558_v14 }
  0xa0   : > { %v562_v16 = vsel %vm560_vm4, %v841_v10, 8  ;;  %v567_v17 = vcvt.s32.f32 %v565_v15  ;;  %v566_v36 = vcvt.s32.f32 %v564_v35 }
  0xa1   : > { %v578_v18 = vsel %vm552_vm2, %v562_v16, 2147483647 }
  0xa2   : > { %568 = vmin.xlane.f32.xlu1 %v567_v17  ;;  %v580_v19 = vshra.s32 %v578_v18, 16  ;;  %v579_v37 = vand.u32 65535, %v578_v18 }
  0xa4   : > { %v582_v20 = vcvt.s32.f32 %v580_v19  ;;  %v581_v40 = vcvt.s32.f32 %v579_v37 }
  0xa6   : > { %583 = vmin.xlane.f32.xlu1 %v582_v20 }
  0xd0   : > { %v392_v22 = vpop.f32.mrf.mxu0 }
  0xd1   : > { %v393_v23 = vadd.f32 %v685_v21, %v392_v22 }
  0xd2   : > { %v711_v24 = vpop.f32.mrf.mxu0 }
  0xd3   : > { %v401_v26 = vmul.f32 0.01, %v393_v23  ;;  %vm399_vm5 = vcmp.gt.f32.partialorder %v393_v23, 0.0 }
  0xd4   : > { %v395_v25 = vpop.f32.mrf.mxu0 }
  0xd5   : > { %v396_v27 = vadd.f32 %v685_v21, %v395_v25  ;;  %v403_v30 = vsel %vm399_vm5, %v393_v23, %v401_v26 }
  0xd6   : > { %v712_v28 = vpop.f32.mrf.mxu0 }
  0xd7   : > { %vm400_vm6 = vcmp.gt.f32.partialorder %v396_v27, 0.0  ;;  %v402_v29 = vmul.f32 0.01, %v396_v27 }
  0xd9   : > { %v404_v31 = vsel %vm400_vm6, %v396_v27, %v402_v29 }
  0xda   : > { %v405_v32 = vpack.c.bf16 %v404_v31, %v403_v30 }
  0xdc   : > { %718 = vmatmul.mubr.msk.bf16.vlgmr.msra.gmra.mxu1 %vm429_vm7, %v405_v32 }
 0x12b   : > { %v569_v38 = vpop.xlane.xlu1 %568 }
 0x12c   : > { %vm570_vm8 = vcmp.eq.f32.partialorder %v567_v17, %v569_v38  ;;  %v575_v55 = vcvt.f32.s32 %v569_v38 }
 0x12d   : > { %v571_v39 = vsel %vm570_vm8, %v566_v36, inf }
 0x12e   : > { %572 = vmin.xlane.f32.xlu0 %v571_v39  ;;  %v576_v57 = vshll.u32 %v575_v55, 16 }
 0x12f   : > { %v584_v41 = vpop.xlane.xlu1 %583 }
 0x130   : > { %vm585_vm9 = vcmp.eq.f32.partialorder %v582_v20, %v584_v41  ;;  %v590_v58 = vcvt.f32.s32 %v584_v41 }
 0x131   : > { %v586_v42 = vsel %vm585_vm9, %v581_v40, inf }
 0x132   : > { %587 = vmin.xlane.f32.xlu1 %v586_v42  ;;  %v591_v61 = vshll.u32 %v590_v58, 16 }
 0x19c   : > { %v467_v44 = vpop.f32.mrf.mxu1 }
 0x19d   : > { %v468_v45 = vadd.f32 %v689_v43, %v467_v44 }
 0x19e   : > { %v719_v46 = vpop.f32.mrf.mxu1 }
 0x19f   : > { %v476_v48 = vmul.f32 0.01, %v468_v45  ;;  %vm474_vm10 = vcmp.gt.f32.partialorder %v468_v45, 0.0 }
 0x1a0   : > { %v470_v47 = vpop.f32.mrf.mxu1 }
 0x1a1   : > { %v471_v49 = vadd.f32 %v689_v43, %v470_v47  ;;  %v478_v52 = vsel %vm474_vm10, %v468_v45, %v476_v48 }
 0x1a2   : > { %v720_v50 = vpop.f32.mrf.mxu1 }
 0x1a3   : > { %vm475_vm11 = vcmp.gt.f32.partialorder %v471_v49, 0.0  ;;  %v477_v51 = vmul.f32 0.01, %v471_v49 }
 0x1a5   : > { %v479_v53 = vsel %vm475_vm11, %v471_v49, %v477_v51 }
 0x1a6   : > { %v480_v54 = vpack.c.bf16 %v479_v53, %v478_v52 }
 0x1a8   : > { %726 = vmatmul.mubr.msk.bf16.vlgmr.msra.gmra.mxu0 %vm429_vm7, %v480_v54 }
 0x1b7   : > { %v573_v56 = vpop.xlane.xlu0 %572 }
 0x1b8   : > { %v574_v59 = vcvt.f32.s32 %v573_v56 }
 0x1ba   : > { %v577_v62 = vadd.s32 %v576_v57, %v574_v59 }
 0x1bb   : > { %v588_v60 = vpop.xlane.xlu1 %587 }
 0x1bc   : > { %v589_v63 = vcvt.f32.s32 %v588_v60  ;;  %vm593_vm12 = vcmp.eq.s32.totalorder %v841_v10, %v577_v62 }
 0x1be   : > { %v592_v3 = vadd.s32 %v591_v61, %v589_v63 }
 0x1c0   : > { %vm594_vm13 = vcmp.eq.s32.totalorder %v841_v10, %v592_v3 }
 0x268   : > { %v541_v1 = vpop.f32.mrf.mxu0 }
 0x269   : > { %v542_v2 = vadd.f32 %v693_v0, %v541_v1 }
 0x26a   : > { %v727_v4 = vpop.f32.mrf.mxu0 }
 0x26b   : > { %v595_v5 = vsel %vm593_vm12, %v542_v2, 0.0 }
 0x26c   : > { %v544_v6 = vpop.f32.mrf.mxu0  ;;  %v597_v7 = vsel %vm552_vm2, %v595_v5, 0.0 }
 0x26d   : > { %v545_v8 = vadd.f32 %v693_v0, %v544_v6  ;;  %598 = vadd.xlane.f32.xlu0 %v597_v7 }
 0x26e   : > { %v728_v9 = vpop.f32.mrf.mxu0 }
 0x26f   : > { %v596_v11 = vsel %vm594_vm13, %v545_v8, 0.0 }
 0x270   : > { %v600_v12 = vsel %vm552_vm2, %v596_v11, 0.0 }
 0x271   : > { %601 = vadd.xlane.f32.xlu1 %v600_v12 }
 0x2f6   : > { %v599_v13 = vpop.xlane.xlu0 %598 }
 0x2f7   : > { %604 = vst.msk [vmem:[%s329_s15] sm:$0xff] %vm603_vm14, %v599_v13 }
 0x2fa   : > { %v602_v14 = vpop.xlane.xlu1 %601 }
 0x2fb   : > { %605 = vst.msk [vmem:[%s329_s15 + $0x8] sm:$0xff] %vm603_vm14, %v602_v14 }
 0x2fc PF: > { %s18_s27 = sadd.s32 1, %s751_s27  }
 0x2fd   : > { %p15_p4 = scmp.ge.s32.totalorder %s18_s27, 4  }
 0x2ff   :  { %17 = sbr.rel (!%p15_p4) target bundleno = 1 (0x1), region = 85 }

</bundles_post_ra>
